<compile_context>
chip_gen: v7x
topology: tpu7x:2x2x1
jax: 0.10.0
libtpu: 0.0.40
codegen_flags: <defaults>
</compile_context>

<pallas_src>
import functools

import jax
import jax.numpy as jnp
from jax.experimental import pallas as pl
from jax.experimental.pallas import tpu as pltpu


def _cdiv(a, b):
    return -(-a // b)


def _layernorm_kernel(x_ref, w_ref, b_ref, o_ref, *, eps, c):
    # x_ref: (BN, C, TL) in input dtype; w_ref/b_ref: (C, 1) f32; o_ref: (BN, C, TL)
    x = x_ref[...].astype(jnp.float32)
    mean = jnp.mean(x, axis=1, keepdims=True)                   # (BN, 1, TL)
    diff = x - mean
    # torch.std default is the unbiased estimator (divide by C - 1).
    # NOTE: like the original module, C == 1 would produce NaN/inf.
    var = jnp.sum(diff * diff, axis=1, keepdims=True) * (1.0 / (c - 1))
    std = jnp.sqrt(var)
    # eps added to std (outside sqrt) to match the PyTorch module exactly.
    # Exact reciprocal: it only touches (BN, 1, TL) values (1/C of the data),
    # so there is no perf reason to approximate it.
    inv = 1.0 / (std + eps)
    w = w_ref[...].astype(jnp.float32)[None, :, :]              # (1, C, 1)
    b = b_ref[...].astype(jnp.float32)[None, :, :]
    # TODO(synk): on v7x with bf16 I/O and large C, do the affine tail in
    # packed bf16 and offload the two C-reductions to the MXU
    # (ones(1,C) @ x, ones(1,C) @ (x*x)) to relieve the VALU slot.
    o_ref[...] = (w * (diff * inv) + b).astype(o_ref.dtype)


def _pick_tiles(n, c, l, itemsize, vmem_limit):
    """Pick (BN, TL) block dims.

    Footprint model per block element:
      2 x (input + output) double-buffered pipeline copies  -> 4 * itemsize
      ~4 f32 in-kernel temporaries (x, diff, normed, affine) -> 16 bytes
    The whole per-step footprint is kept under ~60% of vmem_limit to leave
    headroom for compiler scratch / spills.
    """
    bytes_per_elem = 4 * itemsize + 16
    max_block_elems = max((vmem_limit * 3 // 5) // bytes_per_elem, 8 * 128)

    if l <= 128:
        # Full spatial dim as the last block dim (== array dim is legal even
        # when it is not a multiple of 128).
        tl = l
    else:
        tl_budget = max((max_block_elems // max(c, 1)) // 128 * 128, 128)
        tl = max(128, min(tl_budget, (l // 128) * 128))
        # Keep enough grid points to feed both TensorCores on megacore parts
        # (v7x has 2 TCs/chip): aim for >= 4 points before maxing the tile.
        while tl > 128 and n * _cdiv(l, tl) < 4:
            tl = max(128, (tl // 2) // 128 * 128)

    # Fold the batch dim into the block when channels are few and the spatial
    # axis is already a single block, as long as >= min(n, 4) grid points
    # remain for load balance.
    bn = 1
    spatial_blocks = _cdiv(l, tl)
    if spatial_blocks == 1 and n > 1:
        max_bn_budget = max(max_block_elems // max(c * tl, 1), 1)
        target_points = min(n, 4)
        bn = max(1, min(max_bn_budget, n // target_points))
    return bn, tl


def layer_norm(x_nchw, weight, bias, eps=1e-6):
    """x_nchw: (N, C, H, W); weight/bias: (C,), (C,1) or (C,1,1). Returns (N, C, H, W)."""
    n, c, h, w = x_nchw.shape
    l = h * w
    out_dtype = x_nchw.dtype
    x = x_nchw.reshape(n, c, l)
    itemsize = jnp.dtype(out_dtype).itemsize

    # Generation-aware VMEM budget: ~75% of physical VMEM, capped at 96 MiB.
    #   v5e/v6e (128 MiB physical) -> 96 MiB;  v7x (64 MiB per TC) -> 48 MiB.
    try:
        vmem_cap = int(pltpu.get_tpu_info().vmem_capacity_bytes)
    except Exception:
        vmem_cap = 64 * 1024 * 1024  # conservative fallback (v7x per-TC size)
    vmem_limit = min(vmem_cap * 3 // 4, 96 * 1024 * 1024)

    bn, tl = _pick_tiles(n, c, l, itemsize, vmem_limit)

    w_param = jnp.asarray(weight, jnp.float32).reshape(c, 1)
    b_param = jnp.asarray(bias, jnp.float32).reshape(c, 1)

    kernel = functools.partial(_layernorm_kernel, eps=float(eps), c=c)

    grid = (_cdiv(n, bn), _cdiv(l, tl))
    out = pl.pallas_call(
        kernel,
        out_shape=jax.ShapeDtypeStruct((n, c, l), out_dtype),
        grid_spec=pltpu.PrefetchScalarGridSpec(
            num_scalar_prefetch=0,
            grid=grid,
            in_specs=[
                pl.BlockSpec((bn, c, tl), lambda i, j: (i, 0, j)),
                pl.BlockSpec((c, 1), lambda i, j: (0, 0)),
                pl.BlockSpec((c, 1), lambda i, j: (0, 0)),
            ],
            out_specs=pl.BlockSpec((bn, c, tl), lambda i, j: (i, 0, j)),
        ),
        compiler_params=pltpu.CompilerParams(
            # Both grid axes are fully independent (reduction is over C only),
            # so both shard across TensorCores on megacore parts.
            dimension_semantics=("parallel", "parallel"),
            vmem_limit_bytes=vmem_limit,
        ),
    )(x, w_param, b_param)

    return out.reshape(n, c, h, w)


def _reference(x, weight, bias, eps):
    mean = jnp.mean(x, axis=1, keepdims=True)
    std = jnp.std(x, axis=1, keepdims=True, ddof=1)
    return weight[None] * ((x - mean) / (std + eps)) + bias[None]


if __name__ == "__main__":
    key = jax.random.PRNGKey(0)
    eps = 1e-6

    # Case 1: spatial size a multiple of 128 (L = 256).
    N, C, H, W = 2, 4, 16, 16
    k1, k2 = jax.random.split(key)
    x1 = jax.random.normal(k1, (N, C, H, W), dtype=jnp.float32)
    weight = jnp.ones((C, 1, 1), dtype=jnp.float32)   # matches torch.ones(size,1,1)
    bias = jnp.zeros((C, 1, 1), dtype=jnp.float32)    # matches torch.zeros(size,1,1)

    out1 = layer_norm(x1, weight, bias, eps)
    jax.block_until_ready(out1)
    ref1 = _reference(x1, weight, bias, eps)
    assert jnp.allclose(out1, ref1, atol=1e-5, rtol=1e-5), "mismatch vs reference (case 1)"

    # Case 2: spatial size NOT a multiple of 128 (L = 130) — exercises the
    # partial tail block (no host-side pad/slice anymore).
    H2, W2 = 10, 13
    x2 = jax.random.normal(k2, (N, C, H2, W2), dtype=jnp.float32)
    out2 = layer_norm(x2, weight, bias, eps)
    jax.block_until_ready(out2)
    ref2 = _reference(x2, weight, bias, eps)
    assert jnp.allclose(out2, ref2, atol=1e-5, rtol=1e-5), "mismatch vs reference (case 2)"

    print("KERNEL_OK")
</pallas_src>

<mosaic_0001>
module attributes {stable_mosaic.version = 11 : i64} {
  func.func @_layernorm_kernel(%arg0: i32, %arg1: i32, %arg2: memref<1x4x128xf32, #tpu.memory_space<vmem>>, %arg3: memref<4x1xf32, #tpu.memory_space<vmem>>, %arg4: memref<4x1xf32, #tpu.memory_space<vmem>>, %arg5: memref<1x4x128xf32, #tpu.memory_space<vmem>>) attributes {dimension_semantics = [#tpu.dimension_semantics<parallel>, #tpu.dimension_semantics<parallel>], iteration_bounds = array<i64: 2, 2>, scalar_prefetch = 0 : i64, scratch_operands = 0 : i64, tpu.core_type = #tpu.core_type<tc>, window_params = [{transform_indices = @transform_0, window_bounds = array<i64: 1, 4, 128>}, {pipeline_mode = #tpu.pipeline_mode<synchronous>, transform_indices = @transform_1, window_bounds = array<i64: 4, 1>}, {pipeline_mode = #tpu.pipeline_mode<synchronous>, transform_indices = @transform_2, window_bounds = array<i64: 4, 1>}, {transform_indices = @transform_3, window_bounds = array<i64: 1, 4, 128>}]} {
    %c0 = arith.constant 0 : index
    %c0_0 = arith.constant 0 : index
    %c0_1 = arith.constant 0 : index
    %0 = vector.load %arg2[%c0, %c0_0, %c0_1] : memref<1x4x128xf32, #tpu.memory_space<vmem>>, vector<1x4x128xf32>
    %cst = arith.constant dense<0.000000e+00> : vector<1x128xf32>
    %1 = vector.multi_reduction <add>, %0, %cst [1] : vector<1x4x128xf32> to vector<1x128xf32>
    %2 = vector.shape_cast %1 : vector<1x128xf32> to vector<1x1x128xf32>
    %cst_2 = arith.constant 4.000000e+00 : f32
    %3 = vector.broadcast %cst_2 : f32 to vector<1x1x128xf32>
    %4 = arith.divf %2, %3 : vector<1x1x128xf32>
    %5 = vector.broadcast %4 : vector<1x1x128xf32> to vector<1x4x128xf32>
    %6 = arith.subf %0, %5 : vector<1x4x128xf32>
    %7 = arith.mulf %6, %6 : vector<1x4x128xf32>
    %cst_3 = arith.constant dense<0.000000e+00> : vector<1x128xf32>
    %8 = vector.multi_reduction <add>, %7, %cst_3 [1] : vector<1x4x128xf32> to vector<1x128xf32>
    %9 = vector.shape_cast %8 : vector<1x128xf32> to vector<1x1x128xf32>
    %cst_4 = arith.constant 0.333333343 : f32
    %10 = vector.broadcast %cst_4 : f32 to vector<1x1x128xf32>
    %11 = arith.mulf %9, %10 : vector<1x1x128xf32>
    %12 = math.sqrt %11 : vector<1x1x128xf32>
    %cst_5 = arith.constant 9.99999997E-7 : f32
    %13 = vector.broadcast %cst_5 : f32 to vector<1x1x128xf32>
    %14 = arith.addf %12, %13 : vector<1x1x128xf32>
    %cst_6 = arith.constant 1.000000e+00 : f32
    %15 = vector.broadcast %cst_6 : f32 to vector<1x1x128xf32>
    %16 = arith.divf %15, %14 : vector<1x1x128xf32>
    %c0_7 = arith.constant 0 : index
    %c0_8 = arith.constant 0 : index
    %17 = vector.load %arg3[%c0_7, %c0_8] : memref<4x1xf32, #tpu.memory_space<vmem>>, vector<4x1xf32>
    %18 = vector.shape_cast %17 : vector<4x1xf32> to vector<1x4x1xf32>
    %c0_9 = arith.constant 0 : index
    %c0_10 = arith.constant 0 : index
    %19 = vector.load %arg4[%c0_9, %c0_10] : memref<4x1xf32, #tpu.memory_space<vmem>>, vector<4x1xf32>
    %20 = vector.shape_cast %19 : vector<4x1xf32> to vector<1x4x1xf32>
    %21 = vector.broadcast %16 : vector<1x1x128xf32> to vector<1x4x128xf32>
    %22 = arith.mulf %6, %21 : vector<1x4x128xf32>
    %23 = vector.broadcast %18 : vector<1x4x1xf32> to vector<1x4x128xf32>
    %24 = arith.mulf %23, %22 : vector<1x4x128xf32>
    %25 = vector.broadcast %20 : vector<1x4x1xf32> to vector<1x4x128xf32>
    %26 = arith.addf %24, %25 : vector<1x4x128xf32>
    %c0_11 = arith.constant 0 : index
    %c0_12 = arith.constant 0 : index
    %c0_13 = arith.constant 0 : index
    %27 = vector.load %arg5[%c0_11, %c0_12, %c0_13] : memref<1x4x128xf32, #tpu.memory_space<vmem>>, vector<1x4x128xf32>
    tpu.vector_store %arg5[%c0_11, %c0_12, %c0_13], %26 {strides = array<i32>} : memref<1x4x128xf32, #tpu.memory_space<vmem>>, vector<1x4x128xf32>,
    return
  }
  func.func @transform_0(%arg0: i32, %arg1: i32) -> (i32, i32, i32) {
    %c0_i32 = arith.constant 0 : i32
    %c0_i32_0 = arith.constant 0 : i32
    return %arg0, %c0_i32, %arg1 : i32, i32, i32
  }
  func.func @transform_1(%arg0: i32, %arg1: i32) -> (i32, i32) {
    %c0_i32 = arith.constant 0 : i32
    %c0_i32_0 = arith.constant 0 : i32
    %c0_i32_1 = arith.constant 0 : i32
    return %c0_i32, %c0_i32_0 : i32, i32
  }
  func.func @transform_2(%arg0: i32, %arg1: i32) -> (i32, i32) {
    %c0_i32 = arith.constant 0 : i32
    %c0_i32_0 = arith.constant 0 : i32
    %c0_i32_1 = arith.constant 0 : i32
    return %c0_i32, %c0_i32_0 : i32, i32
  }
  func.func @transform_3(%arg0: i32, %arg1: i32) -> (i32, i32, i32) {
    %c0_i32 = arith.constant 0 : i32
    %c0_i32_0 = arith.constant 0 : i32
    return %arg0, %c0_i32, %arg1 : i32, i32, i32
  }
}

</mosaic_0001>

<bundles_post_ra>
// kernel: tpu_custom_call.1
= control target key start
LH: loop header
LB: loop body
LE: loop exit
PB: predicated region body
PF: predicated region fallthrough
CT: control target
= control target key end

     0   :  { %8 = vsyncpa [#allocation3], 0  ;;  %s808_s0 = inlined_call_operand.hbm [shape: f32[2,4,256], index: 0, kind: input, shape index: {}]   ;;  %s809_s1 = inlined_call_operand.vmem [shape: f32[4,1], index: 1, kind: input, shape index: {}]   ;;  %s810_s2 = inlined_call_operand.vmem [shape: f32[4,1], index: 2, kind: input, shape index: {}]   ;;  %s811_s3 = inlined_call_operand.hbm [shape: f32[2,4,256], index: 3, kind: output, shape index: {}]  }
   0x1   :  { %10 = vsyncpa [#allocation3 + $0x1], 0 }
   0x2   :  { %11 = vsyncpa [#allocation4], 0 }
   0x3   :  { %13 = vsyncpa [#allocation4 + $0x1], 0  ;;  %s604_s12 = smov 0   ;;  %s606_s13 = smov 0  }
   0x4   :  { %s608_s14 = smov 0   ;;  %s610_s15 = smov 0  }
   0x5   :  { %s612_s16 = smov 0   ;;  %s614_s17 = smov 0  }
   0x6   :  { %s616_s18 = smov 0   ;;  %s618_s19 = smov 0  }
   0x7 LB: > { %s352_s20 = sadd.s32 4294967295, %s579_s19   ;;  %s353_s21 = sadd.s32 4294967294, %s579_s19   ;;  %s579_s19 = sphi %s618_s19, %s19_s19   ;;  %s575_s18 = sphi %s616_s18, %s828_s18   ;;  %s571_s17 = sphi %s614_s17, %s827_s17   ;;  %s567_s16 = sphi %s612_s16, %s826_s16   ;;  %s563_s15 = sphi %s610_s15, %s825_s15   ;;  %s559_s14 = sphi %s608_s14, %s824_s14   ;;  %s555_s13 = sphi %s606_s13, %s823_s13   ;;  %s551_s12 = sphi %s604_s12, %s822_s12  }
   0x8   : > { %s28_s22 = sadd.s32 1, %s571_s17  ;;  %s31_s23 = sadd.s32 1, %s575_s18 }
   0x9   : > { %p29_p0 = scmp.ge.s32.totalorder %s28_s22, 2  ;;  %s40_s24 = sadd.s32 1, %s559_s14 }
   0xa   : > { %p47_p1 = scmp.ne.s32.totalorder %s559_s14, %s555_s13  ;;  %p48_p2 = scmp.eq.s32.totalorder %s579_s19, 0 }
   0xb   : > { %s830_s22 = smov (%p29_p0, %s28_s22), 0  ;;  %s832_s23 = smov (!%p29_p0, %s31_s23), %s575_s18 }
   0xc   : > { %s36_s25 = ssub.s32 %s571_s17, %s830_s22  ;;  %p657_p3 = por %p48_p2, %p47_p1 }
   0xd   : > { %p33_p4 = scmp.ge.s32.totalorder %s832_s23, 2  ;;  %p53_p5 = scmp.ne.s32.totalorder %s555_s13, %s551_s12 }
   0xe   : > { %p54_p6 = scmp.eq.s32.totalorder %s352_s20, 0  ;;  %p121_p7 = scmp.eq.s32.totalorder %s352_s20, 3 }
   0xf   : > { %s834_s23 = smov (%p33_p4, %s832_s23), 0  ;;  %p127_p10 = scmp.eq.s32.totalorder %s353_s21, 3 }
  0x10   : > { %p665_p8 = por %p54_p6, %p53_p5  ;;  %p669_p9 = por %p121_p7, %p47_p1 }
  0x11   : > { %s35_s29 = ssub.s32 %s575_s18, %s834_s23  ;;  %p675_p12 = por %p127_p10, %p53_p5 }
  0x12   : > { %s815_s28 = scalar_select %p669_p9, 1, 0 }
  0x13   : > { %s37_s30 = sor.u32 %s36_s25, %s35_s29  ;;  %p379_p13 = scmp.lt.s32.totalorder %s579_s19, 4 }
  0x14   : > { %p38_p11 = scmp.eq.s32.totalorder %s37_s30, 0  ;;  %s153_s5 = sand.u32 1, %s559_s14  }
  0x15   : > { %s816_s4 = scalar_select %p675_p12, 1, 0 }
  0x16   : > { %s682_s6 = scalar_select %p38_p11, %s559_s14, %s40_s24  }
  0x17   : > { %s356_s7 = sshll.u32 %s153_s5, 2  ;;  %s357_s8 = sshll.u32 %s575_s18, 1 }
  0x18   : > { %s162_s9 = sadd.s32 %s571_s17, %s357_s8  ;;  %s157_s10 = scalar_lea.vmem [#allocation2], %s356_s7 }
  0x19   : > { %s166_s11 = sshll.u32 %s157_s10, 4  ;;  %s358_s20 = sshll.u32 %s162_s9, 6  ;;  %s686_s11 = int_to_ptr.vmem [resolvable:$true] %s166_s11 }
  0x1a   : > { %s691_s29 = scalar_lea.hbm %s808_s0, %s358_s20  ;;  %p695_p0 = pnand %p379_p13, %p657_p3 }
  0x1b   : > { %s154_s30 = scalar_lea.sflag [#allocation3], %s153_s5  ;;  %s451_s7 = scalar_lea.hbm %s691_s29, 64 }
  0x1c   : > { %p452_p4 = scmp.ne.s32.totalorder %s691_s29, %s451_s7  ;;  %p453_p5 = pneg %p695_p0 }
  0x1d   : > { %s456_s9 = scalar_lea.hbm %s808_s0, 256  ;;  %p457_p3 = scmp.lt.u32.totalorder %s691_s29, %s808_s0 }
  0x1e   : > { %p454_p6 = pnand %p453_p5, %p452_p4  ;;  %p458_p10 = scmp.lt.u32.totalorder %s456_s9, %s451_s7 }
  0x1f   : > { %p460_p13 = scmp.lt.u32.totalorder %s451_s7, %s691_s29 }
  0x20   : > { %p455_p7 = pneg %p454_p6  ;;  %p459_p11 = por %p458_p10, %p457_p3 }
  0x22   : > { %p461_p1 = por %p460_p13, %p459_p11 }
  0x24   : > { %p462_p2 = pnand %p461_p1, %p455_p7 }
  0x26   : > { %465 = shalt.err (!%p462_p2)
}
  0x27   : > { %s466_s5 = scalar_lea.vmem %s686_s11, 64  ;;  %s581_s21 = smov [#allocation2]  }
  0x28   : > { %p467_p4 = scmp.ne.s32.totalorder %s686_s11, %s466_s5  ;;  %s471_s25 = sshll.u32 %s581_s21, 4  ;;  %s472_s25 = int_to_ptr.vmem [resolvable:$false] %s471_s25 }
  0x29   : > { %s473_s26 = scalar_lea.vmem %s472_s25, 128  ;;  %p474_p9 = scmp.lt.s32.totalorder %s686_s11, %s472_s25 }
  0x2a   : > { %p469_p6 = pnand %p467_p4, %p453_p5  ;;  %p475_p3 = scmp.lt.s32.totalorder %s473_s26, %s466_s5 }
  0x2c   : > { %p470_p12 = pneg %p469_p6  ;;  %p476_p10 = por %p475_p3, %p474_p9 }
  0x2e   : > { %p477_p11 = pnand %p476_p10, %p470_p12 }
  0x30   : > { %480 = shalt.err (!%p477_p11)
}
  0x31   : > { %374 = dma.hbm_to_vmem [thread:$0]  (!%p695_p0), %s691_s29, 64, %s686_s11, %s154_s30  }
  0x32   : > { %p818_p1 = scmp.lt.s32.totalorder %s579_s19, 5  ;;  %p819_p2 = scmp.ge.s32.totalorder %s579_s19, 1 }
  0x34   : > { %p172_p5 = pnand %p819_p2, %p818_p1 }
  0x35   : > { %s731_s7 = sand.u32 (!%p172_p5), 1, %s555_s13  }
  0x36   : > { %175 = sbr.rel (%p172_p5) target bundleno = 212 (0xd4), region = 32  ;;  %s360_s8 = sshll.u32 (!%p172_p5), %s731_s7, 2 }
  0x37   : > { %s178_s9 = scalar_lea.sflag (!%p172_p5), [#allocation3], %s731_s7  ;;  %s181_s24 = scalar_lea.vmem (!%p172_p5), [#allocation2], %s360_s8 }
  0x3d   : > { %542 = dma.done.wait (%p665_p8), %s178_s9, 64  }
  0x3e   : > { %544 = vsyncadd (%p665_p8), %s178_s9, 4294967232  ;;  %v582_v0 = vmov 0   ;;  %v235_v1 = vld [vmem:[%s809_s1] sm:$0xf]  ;;  %vm205_vm0 = vcmask 1043456   ;;  %s363_s27 = sshll.u32 %s567_s16, 1 }
  0x3f   : > { %446 = vset.pattern.permute.xlu0 %v582_v0  ;;  %v236_v2 = vld [vmem:[%s810_s2] sm:$0xf]  ;;  %s263_s20 = sadd.s32 %s563_s15, %s363_s27  ;;  %s203_s21 = scalar_lea.vmem [#allocation5], %s360_s8 }
  0x40   : > { %240 = vperm.xlu0 %446, %v235_v1   ;;  %v204_v3 = vld [vmem:[%s181_s24] sm:$0xf]  ;;  %s364_s5 = sshll.u32 %s263_s20, 6  ;;  %s267_s25 = sshll.u32 %s203_s21, 4  ;;  %s756_s25 = int_to_ptr.vmem [resolvable:$true] %s267_s25 }
  0x41   : > { %v206_v4 = vsel %vm205_vm0, %v204_v3, 0.0  ;;  %s754_s24 = scalar_lea.hbm %s811_s3, %s364_s5  ;;  %s252_s15 = scalar_lea.sflag [#allocation4], %s731_s7 }
  0x42   : > { %v207_v5 = vrot.slane %v206_v4, 4  ;;  %s481_s16 = scalar_lea.vmem %s756_s25, 64  ;;  %p820_p9 = scmp.ne.s32.totalorder %s815_s28, 0 }
  0x43   : > { %p482_p8 = scmp.ne.s32.totalorder %s756_s25, %s481_s16  ;;  %s583_s8 = smov [#allocation5]  }
  0x44   : > { %246 = vperm.xlu0 %446, %v236_v2   ;;  %v208_v6 = vadd.f32 %v207_v5, %v206_v4  ;;  %s485_s11 = sshll.u32 %s583_s8, 4  ;;  %s486_s11 = int_to_ptr.vmem [resolvable:$false] %s485_s11 }
  0x45   : > { %p483_p12 = pnand %p482_p8, %p820_p9  ;;  %s487_s29 = scalar_lea.vmem %s486_s11, 128 }
  0x46   : > { %v209_v7 = vrot.slane %v208_v6, 2  ;;  %p488_p7 = scmp.lt.s32.totalorder %s756_s25, %s486_s11  ;;  %p489_p13 = scmp.lt.s32.totalorder %s487_s29, %s481_s16 }
  0x47   : > { %p484_p0 = pneg %p483_p12 }
  0x48   : > { %v210_v8 = vadd.f32 %v209_v7, %v208_v6  ;;  %p490_p4 = por %p489_p13, %p488_p7 }
  0x4a   : > { %v211_v9 = vrot.slane %v210_v8, 1  ;;  %p491_p6 = pnand %p490_p4, %p484_p0 }
  0x4c   : > { %v212_v10 = vadd.f32 %v211_v9, %v210_v8 }
  0x4e   : > { %v214_v11 = vmul.f32 0.25, %v212_v10 }
  0x50   : > { %v215_v12 = vsub.f32 %v204_v3, %v214_v11 }
  0x52   : > { %v216_v13 = vmul.f32 %v215_v12, %v215_v12 }
  0x54   : > { %v217_v14 = vsel %vm205_vm0, %v216_v13, 0.0 }
  0x55   : > { %v218_v15 = vrot.slane %v217_v14, 4 }
  0x57   : > { %v219_v16 = vadd.f32 %v218_v15, %v217_v14 }
  0x59   : > { %v220_v17 = vrot.slane %v219_v16, 2 }
  0x5b   : > { %v221_v18 = vadd.f32 %v220_v17, %v219_v16 }
  0x5d   : > { %v222_v19 = vrot.slane %v221_v18, 1 }
  0x5f   : > { %v223_v20 = vadd.f32 %v222_v19, %v221_v18 }
  0x61   : > { %v224_v21 = vmul.f32 0.33333334, %v223_v20 }
  0x63   : > { %447 = vrsqrt.f32 %v224_v21  ;;  %vm227_vm1 = vcmp.eq.f32.partialorder %v224_v21, inf  ;;  %v230_v24 = vand.u32 2147483648, %v224_v21  ;;  %vm229_vm2 = vcmp.eq.f32.partialorder %v224_v21, 0.0 }
  0x6d   : > { %v448_v22 = vpop.eup %447 }
  0x6e   : > { %v226_v23 = vmul.f32 %v448_v22, %v224_v21 }
  0x70   : > { %v228_v25 = vsel %vm227_vm1, %v224_v21, %v226_v23 }
  0x71   : > { %v231_v26 = vsel %vm229_vm2, %v230_v24, %v228_v25 }
  0x72   : > { %v232_v27 = vadd.f32 1e-06, %v231_v26 }
  0x74   : > { %449 = vrcp.f32 %v232_v27 }
  0x7e   : > { %v450_v28 = vpop.eup %449 }
  0x7f   : > { %v237_v29 = vmul.f32 %v450_v28, %v215_v12 }
  0xbf   : > { %v241_v30 = vpop.permute.xlu0 %240 }
  0xc0   : > { %v243_v31 = vmul.f32 %v241_v30, %v237_v29 }
  0xc3   : > { %v247_v32 = vpop.permute.xlu0 %246 }
  0xc4   : > { %v249_v33 = vadd.f32 %v247_v32, %v243_v31 }
  0xc6   : > { %250 = vst [vmem:[%s203_s21] sm:$0xf] %v249_v33 }
  0xc7   : > { %494 = shalt.err (!%p491_p6)
}
  0xc8   : > { %s495_s7 = scalar_lea.hbm %s754_s24, 64  ;;  %s499_s27 = scalar_lea.hbm %s811_s3, 256 }
  0xc9   : > { %p496_p3 = scmp.ne.s32.totalorder %s754_s24, %s495_s7  ;;  %p500_p1 = scmp.lt.u32.totalorder %s754_s24, %s811_s3 }
  0xca   : > { %p501_p2 = scmp.lt.u32.totalorder %s499_s27, %s495_s7  ;;  %p503_p8 = scmp.lt.u32.totalorder %s495_s7, %s754_s24 }
  0xcb   : > { %p497_p10 = pnand %p496_p3, %p820_p9 }
  0xcc   : > { %p502_p5 = por %p501_p2, %p500_p1 }
  0xcd   : > { %p498_p11 = pneg %p497_p10 }
  0xce   : > { %p504_p12 = por %p503_p8, %p502_p5 }
  0xd0   : > { %p505_p0 = pnand %p504_p12, %p498_p11 }
  0xd2   : > { %508 = shalt.err (!%p505_p0)
}
  0xd3   : > { %369 = dma.vmem_to_hbm [thread:$0]  (%p820_p9), %s756_s25, 64, %s754_s24, %s252_s15  }
  0xd4 PF: > { %p380_p7 = scmp.ge.s32.totalorder %s579_s19, 2  ;;  %s279_s21 = sand.u32 1, %s551_s12  }
  0xd5   : > { %p821_p13 = scmp.ne.s32.totalorder %s816_s4, 0  ;;  %s280_s26 = scalar_lea.sflag [#allocation4], %s279_s21 }
  0xd7   : > { %p376_p4 = pnand %p380_p7, %p821_p13 }
  0xd9   : > { %546 = dma.done.wait (!%p376_p4), %s280_s26, 64  }
  0xda   : > { %548 = vsyncadd (!%p376_p4), %s280_s26, 4294967232  ;;  %s19_s19 = sadd.s32 1, %s579_s19   ;;  %s822_s12 = smov %s555_s13 }
  0xdb   : > { %p16_p6 = scmp.ge.s32.totalorder %s19_s19, 6   ;;  %s823_s13 = smov %s559_s14 }
  0xdc   : > { %s824_s14 = smov %s682_s6  ;;  %s825_s15 = smov %s571_s17 }
  0xdd   : > { %s826_s16 = smov %s575_s18  ;;  %s827_s17 = smov %s830_s22 }
  0xde   : > { %s828_s18 = smov %s834_s23  ;;  %18 = sbr.rel (!%p16_p6) target bundleno = 7 (0x7), region = 77 }
  0xe5   :  { %285 = vsyncpa [#allocation3], 1 }
  0xe6   :  { %287 = vsyncpa [#allocation3 + $0x1], 1 }
  0xe7   :  { %288 = vsyncpa [#allocation4], 1 }
  0xe8   :  { %290 = vsyncpa [#allocation4 + $0x1], 1 }

</bundles_post_ra>
